<compile_context>
chip_gen: v5e
topology: v5e:2x2
jax: 0.10.0
libtpu: 0.0.40
codegen_flags: <defaults>
</compile_context>

<pallas_src>
import math

import jax
import jax.numpy as jnp
from jax.experimental import pallas as pl
from jax.experimental.pallas import tpu as pltpu

# ----- synthetic-BERT hyperparameters (small, consistent with the module) -----
B = 2              # batch
S = 8              # sequence length
H = 32             # hidden_size (stand-in for 768)
NUM_HEADS = 2
HEAD_DIM = H // NUM_HEADS
FFN = 64
NUM_CLASSES = 7
VOCAB = 50
VOCAB_PAD = 64     # pad vocab so the stacked table has room for seg/pos rows
TYPE_VOCAB = 2
DR_RATE = 0.5      # dropout is identity at inference time (eval mode)

BS = B * S
LANE = 128         # lane-dense width for padded weights / bias slab / output
NEG_INF = -1e9

# rows of the packed bias / layernorm slab (16, 128)
(R_BQKV, R_BO, R_G1, R_B1, R_BF1, R_BF2,
 R_G2, R_B2, R_BP, R_BC, R_G0, R_B0) = range(12)
VEC_ROWS = 16


def _layernorm(x, g, b, eps=1e-12):
    mu = jnp.mean(x, axis=-1, keepdims=True)
    var = jnp.mean((x - mu) * (x - mu), axis=-1, keepdims=True)
    return (x - mu) * jax.lax.rsqrt(var + eps) * g + b


def _gelu(x):
    # TODO(synk): tanh-approximate GELU; HF BERT default is the exact erf GELU
    # (difference is well within tolerance at these scales).
    c = math.sqrt(2.0 / math.pi)
    return 0.5 * x * (1.0 + jnp.tanh(c * (x + 0.044715 * x * x * x)))


def bert_classifier_kernel(
    sel_ref, bias_ref,
    emb_ref, vec_ref,
    wqkv_ref, wo_ref, wf1_ref, wf2_ref, wp_ref, wc_ref,
    o_ref,
):
    f32 = jnp.float32
    bf16 = jnp.bfloat16

    def vrow(r, w=LANE):
        return vec_ref[r:r + 1, 0:w]          # (1, w) slice of the bias slab

    # ---- fused word + segment + position embedding via one one-hot matmul ----
    col = jax.lax.broadcasted_iota(jnp.int32, (BS, LANE), 1)
    sel = sel_ref[...]                                              # (BS, 3) i32
    onehot = ((col == sel[:, 0:1]) | (col == sel[:, 1:2]) | (col == sel[:, 2:3]))
    emb = jnp.dot(onehot.astype(bf16), emb_ref[...],
                  preferred_element_type=f32)                       # (BS, H)
    x = _layernorm(emb, vrow(R_G0, H), vrow(R_B0, H))               # f32

    # ---- fused QKV projection (weight padded to 128 lanes) ----
    qkv = (jnp.dot(x.astype(bf16), wqkv_ref[...],
                   preferred_element_type=f32) + vrow(R_BQKV))      # (BS, 128)
    q = qkv[:, 0:H]
    k = qkv[:, H:2 * H]
    v = qkv[:, 2 * H:3 * H]

    scale = 1.0 / math.sqrt(HEAD_DIM)
    bias = bias_ref[...]            # (BS, BS) block-diagonal + key-validity bias

    # ---- batched multi-head attention over the flattened (B*S) axis ----
    def heads(t):                   # (BS, H) -> (NUM_HEADS, BS, HEAD_DIM), bf16
        return jnp.stack(
            [t[:, h * HEAD_DIM:(h + 1) * HEAD_DIM] for h in range(NUM_HEADS)],
            axis=0).astype(bf16)

    qh, kh, vh = heads(q), heads(k), heads(v)
    scores = (jnp.einsum('hqd,hkd->hqk', qh, kh,
                         preferred_element_type=f32) * scale
              + bias[None, :, :])                                   # (NH, BS, BS)
    scores = scores - jnp.max(scores, axis=-1, keepdims=True)
    p = jnp.exp(scores)
    p = p * pl.reciprocal(jnp.sum(p, axis=-1, keepdims=True), approx=True)
    ctxh = jnp.einsum('hqk,hkd->hqd', p.astype(bf16), vh,
                      preferred_element_type=f32)                   # (NH, BS, HD)
    ctx = jnp.concatenate([ctxh[h] for h in range(NUM_HEADS)], axis=-1)  # (BS, H)

    attn_out = (jnp.dot(ctx.astype(bf16), wo_ref[...],
                        preferred_element_type=f32) + vrow(R_BO, H))
    h1 = _layernorm(x + attn_out, vrow(R_G1, H), vrow(R_B1, H))

    # ---- feed-forward (wf1 padded to 128 lanes, wf2 padded to 128 rows) ----
    ff = (jnp.dot(h1.astype(bf16), wf1_ref[...],
                  preferred_element_type=f32) + vrow(R_BF1))        # (BS, 128)
    ff = _gelu(ff)                                                  # f32
    ff = (jnp.dot(ff.astype(bf16), wf2_ref[...],
                  preferred_element_type=f32) + vrow(R_BF2, H))     # (BS, H)
    h2 = _layernorm(h1 + ff, vrow(R_G2, H), vrow(R_B2, H))

    # ---- pooler + classifier (computed for every row; wrapper keeps CLS) ----
    pooled = jnp.tanh(jnp.dot(h2.astype(bf16), wp_ref[...],
                              preferred_element_type=f32) + vrow(R_BP, H))
    # dropout (dr_rate) is identity at inference time (eval mode)
    logits = (jnp.dot(pooled.astype(bf16), wc_ref[...],
                      preferred_element_type=f32) + vrow(R_BC))     # (BS, 128)
    o_ref[...] = logits


def init_params(key):
    ks = jax.random.split(key, 16)
    n = lambda k, shape: (0.02 * jax.random.normal(k, shape)).astype(jnp.float32)
    z = lambda shape: jnp.zeros(shape, jnp.float32)
    o = lambda shape: jnp.ones(shape, jnp.float32)
    return dict(
        word_emb=n(ks[0], (VOCAB, H)),
        seg_emb=n(ks[1], (TYPE_VOCAB, H)),
        pos_emb=n(ks[2], (S, H)),
        g0=o((1, H)), b0=z((1, H)),                 # embedding layernorm
        wq=n(ks[3], (H, H)), bq=z((1, H)),
        wk=n(ks[4], (H, H)), bk=z((1, H)),
        wv=n(ks[5], (H, H)), bv=z((1, H)),
        wo=n(ks[6], (H, H)), bo=z((1, H)),
        g1=o((1, H)), b1=z((1, H)),
        wf1=n(ks[7], (H, FFN)), bf1=z((1, FFN)),
        wf2=n(ks[8], (FFN, H)), bf2=z((1, H)),
        g2=o((1, H)), b2=z((1, H)),
        wp=n(ks[9], (H, H)), bp=z((1, H)),
        wc=n(ks[10], (H, NUM_CLASSES)), bc=z((1, NUM_CLASSES)),
    )


def pack_params(p):
    """Fuse QKV, stack all embeddings into one (128, H) table, pad every
    weight/bias to 128 lanes, store matmul weights in bf16."""
    f32, bf16 = jnp.float32, jnp.bfloat16

    wqkv = jnp.concatenate([p["wq"], p["wk"], p["wv"]], axis=1)      # (H, 3H)
    bqkv = jnp.concatenate([p["bq"], p["bk"], p["bv"]], axis=1)      # (1, 3H)
    wqkv_pad = jnp.zeros((H, LANE), f32).at[:, :3 * H].set(wqkv)
    wf1_pad = jnp.zeros((H, LANE), f32).at[:, :FFN].set(p["wf1"])
    wf2_pad = jnp.zeros((LANE, H), f32).at[:FFN, :].set(p["wf2"])
    wc_pad = jnp.zeros((H, LANE), f32).at[:, :NUM_CLASSES].set(p["wc"])
    bc_pad = jnp.zeros((1, LANE), f32).at[:, :NUM_CLASSES].set(p["bc"])

    # stacked embedding table: [word (0..63 pad) | segment (64..65) | pos (66..73)]
    emb_tbl = jnp.zeros((LANE, H), f32)
    emb_tbl = emb_tbl.at[:VOCAB, :].set(p["word_emb"])
    emb_tbl = emb_tbl.at[VOCAB_PAD:VOCAB_PAD + TYPE_VOCAB, :].set(p["seg_emb"])
    emb_tbl = emb_tbl.at[
        VOCAB_PAD + TYPE_VOCAB:VOCAB_PAD + TYPE_VOCAB + S, :].set(p["pos_emb"])

    vecs = jnp.zeros((VEC_ROWS, LANE), f32)

    def put(slab, r, row_vec):
        w = row_vec.shape[-1]
        return slab.at[r, :w].set(row_vec.reshape(w))

    vecs = put(vecs, R_BQKV, bqkv)
    vecs = put(vecs, R_BO, p["bo"])
    vecs = put(vecs, R_G1, p["g1"])
    vecs = put(vecs, R_B1, p["b1"])
    vecs = put(vecs, R_BF1, p["bf1"])
    vecs = put(vecs, R_BF2, p["bf2"])
    vecs = put(vecs, R_G2, p["g2"])
    vecs = put(vecs, R_B2, p["b2"])
    vecs = put(vecs, R_BP, p["bp"])
    vecs = put(vecs, R_BC, bc_pad)
    vecs = put(vecs, R_G0, p["g0"])
    vecs = put(vecs, R_B0, p["b0"])

    return dict(
        emb_tbl=emb_tbl.astype(bf16),
        vecs=vecs,                                   # small vectors stay f32
        wqkv=wqkv_pad.astype(bf16),
        wo=p["wo"].astype(bf16),
        wf1=wf1_pad.astype(bf16),
        wf2=wf2_pad.astype(bf16),
        wp=p["wp"].astype(bf16),
        wc=wc_pad.astype(bf16),
    )


@jax.jit
def bert_classifier(token_ids, valid_length, segment_ids, packed):
    row = jnp.arange(BS, dtype=jnp.int32)
    tok = token_ids.reshape(BS).astype(jnp.int32)
    seg = segment_ids.reshape(BS).astype(jnp.int32)
    # column selectors into the stacked (128, H) embedding table
    sel = jnp.stack(
        [tok, VOCAB_PAD + seg, VOCAB_PAD + TYPE_VOCAB + (row % S)],
        axis=1).astype(jnp.int32)                                    # (BS, 3)

    # gen_attention_mask, flattened: attend only within the same batch element
    # and only to key positions < valid_length (block-diagonal bias).
    batch_idx = row // S
    pos_idx = row % S
    key_valid = pos_idx < valid_length[batch_idx]
    allowed = (batch_idx[:, None] == batch_idx[None, :]) & key_valid[None, :]
    attn_bias = jnp.where(allowed, 0.0, NEG_INF).astype(jnp.float32)  # (BS, BS)

    vmem = pl.BlockSpec(memory_space=pltpu.MemorySpace.VMEM)
    out = pl.pallas_call(
        bert_classifier_kernel,
        out_shape=jax.ShapeDtypeStruct((BS, LANE), jnp.float32),
        in_specs=[vmem] * 10,
        out_specs=vmem,
    )(
        sel, attn_bias,
        packed["emb_tbl"], packed["vecs"],
        packed["wqkv"], packed["wo"], packed["wf1"], packed["wf2"],
        packed["wp"], packed["wc"],
    )
    # CLS row of each batch element; keep only the real logit lanes.
    return out.reshape(B, S, LANE)[:, 0, :NUM_CLASSES]


if __name__ == "__main__":
    key = jax.random.PRNGKey(0)
    k_param, k_tok = jax.random.split(key)
    params = init_params(k_param)
    packed = pack_params(params)

    token_ids = jax.random.randint(k_tok, (B, S), 0, VOCAB, dtype=jnp.int32)
    valid_length = jnp.array([5, 8], dtype=jnp.int32)
    segment_ids = jnp.zeros((B, S), dtype=jnp.int32)

    logits = bert_classifier(token_ids, valid_length, segment_ids, packed)
    jax.block_until_ready(logits)
    assert logits.shape == (B, NUM_CLASSES)
    assert bool(jnp.all(jnp.isfinite(logits)))
    print("KERNEL_OK")
</pallas_src>

<mosaic_0001>
module attributes {stable_mosaic.version = 11 : i64} {
  func.func @bert_classifier_kernel(%arg0: memref<16x3xi32, #tpu.memory_space<vmem>>, %arg1: memref<16x16xf32, #tpu.memory_space<vmem>>, %arg2: memref<128x32xbf16, #tpu.memory_space<vmem>>, %arg3: memref<16x128xf32, #tpu.memory_space<vmem>>, %arg4: memref<32x128xbf16, #tpu.memory_space<vmem>>, %arg5: memref<32x32xbf16, #tpu.memory_space<vmem>>, %arg6: memref<32x128xbf16, #tpu.memory_space<vmem>>, %arg7: memref<128x32xbf16, #tpu.memory_space<vmem>>, %arg8: memref<32x32xbf16, #tpu.memory_space<vmem>>, %arg9: memref<32x128xbf16, #tpu.memory_space<vmem>>, %arg10: memref<16x128xf32, #tpu.memory_space<vmem>>) attributes {dimension_semantics = [], scalar_prefetch = 0 : i64, scratch_operands = 0 : i64, tpu.core_type = #tpu.core_type<tc>} {
    %0 = tpu.iota {dimensions = array<i32: 1>} : vector<16x128xi32>
    %c0 = arith.constant 0 : index
    %c0_0 = arith.constant 0 : index
    %1 = vector.load %arg0[%c0, %c0_0] : memref<16x3xi32, #tpu.memory_space<vmem>>, vector<16x3xi32>
    %2 = vector.extract_strided_slice %1 {offsets = [0, 0], sizes = [16, 1], strides = [1, 1]} : vector<16x3xi32> to vector<16x1xi32>
    %3 = vector.broadcast %2 : vector<16x1xi32> to vector<16x128xi32>
    %4 = arith.cmpi eq, %0, %3 : vector<16x128xi32>
    %5 = vector.extract_strided_slice %1 {offsets = [0, 1], sizes = [16, 1], strides = [1, 1]} : vector<16x3xi32> to vector<16x1xi32>
    %6 = vector.broadcast %5 : vector<16x1xi32> to vector<16x128xi32>
    %7 = arith.cmpi eq, %0, %6 : vector<16x128xi32>
    %8 = arith.ori %4, %7 : vector<16x128xi1>
    %9 = vector.extract_strided_slice %1 {offsets = [0, 2], sizes = [16, 1], strides = [1, 1]} : vector<16x3xi32> to vector<16x1xi32>
    %10 = vector.broadcast %9 : vector<16x1xi32> to vector<16x128xi32>
    %11 = arith.cmpi eq, %0, %10 : vector<16x128xi32>
    %12 = arith.ori %8, %11 : vector<16x128xi1>
    %13 = arith.extui %12 : vector<16x128xi1> to vector<16x128xi32>
    %14 = arith.sitofp %13 : vector<16x128xi32> to vector<16x128xf32>
    %15 = arith.truncf %14 : vector<16x128xf32> to vector<16x128xbf16>
    %c0_1 = arith.constant 0 : index
    %c0_2 = arith.constant 0 : index
    %16 = vector.load %arg2[%c0_1, %c0_2] : memref<128x32xbf16, #tpu.memory_space<vmem>>, vector<128x32xbf16>
    %cst = arith.constant dense<0.000000e+00> : vector<16x32xf32>
    %17 = tpu.matmul %15, %16, %cst {dimension_numbers = #tpu.dot_dimension_numbers<[1], [0], [0], [1], [0, 0, 1, 1], [], []>} : vector<16x128xbf16>, vector<128x32xbf16>, vector<16x32xf32> -> vector<16x32xf32>
    %c10 = arith.constant 10 : index
    %c0_3 = arith.constant 0 : index
    %18 = vector.load %arg3[%c10, %c0_3] : memref<16x128xf32, #tpu.memory_space<vmem>>, vector<1x32xf32>
    %c11 = arith.constant 11 : index
    %c0_4 = arith.constant 0 : index
    %19 = vector.load %arg3[%c11, %c0_4] : memref<16x128xf32, #tpu.memory_space<vmem>>, vector<1x32xf32>
    %cst_5 = arith.constant dense<0.000000e+00> : vector<16xf32>
    %20 = vector.multi_reduction <add>, %17, %cst_5 [1] : vector<16x32xf32> to vector<16xf32>
    %21 = vector.shape_cast %20 : vector<16xf32> to vector<16x1xf32>
    %cst_6 = arith.constant 3.200000e+01 : f32
    %22 = vector.broadcast %cst_6 : f32 to vector<16x1xf32>
    %23 = arith.divf %21, %22 : vector<16x1xf32>
    %24 = vector.broadcast %23 : vector<16x1xf32> to vector<16x32xf32>
    %25 = arith.subf %17, %24 : vector<16x32xf32>
    %26 = vector.broadcast %23 : vector<16x1xf32> to vector<16x32xf32>
    %27 = arith.subf %17, %26 : vector<16x32xf32>
    %28 = arith.mulf %25, %27 : vector<16x32xf32>
    %cst_7 = arith.constant dense<0.000000e+00> : vector<16xf32>
    %29 = vector.multi_reduction <add>, %28, %cst_7 [1] : vector<16x32xf32> to vector<16xf32>
    %30 = vector.shape_cast %29 : vector<16xf32> to vector<16x1xf32>
    %cst_8 = arith.constant 3.200000e+01 : f32
    %31 = vector.broadcast %cst_8 : f32 to vector<16x1xf32>
    %32 = arith.divf %30, %31 : vector<16x1xf32>
    %33 = vector.broadcast %23 : vector<16x1xf32> to vector<16x32xf32>
    %34 = arith.subf %17, %33 : vector<16x32xf32>
    %cst_9 = arith.constant 9.99999996E-13 : f32
    %35 = vector.broadcast %cst_9 : f32 to vector<16x1xf32>
    %36 = arith.addf %32, %35 : vector<16x1xf32>
    %37 = math.rsqrt %36 : vector<16x1xf32>
    %38 = vector.broadcast %37 : vector<16x1xf32> to vector<16x32xf32>
    %39 = arith.mulf %34, %38 : vector<16x32xf32>
    %40 = vector.broadcast %18 : vector<1x32xf32> to vector<16x32xf32>
    %41 = arith.mulf %39, %40 : vector<16x32xf32>
    %42 = vector.broadcast %19 : vector<1x32xf32> to vector<16x32xf32>
    %43 = arith.addf %41, %42 : vector<16x32xf32>
    %44 = arith.truncf %43 : vector<16x32xf32> to vector<16x32xbf16>
    %c0_10 = arith.constant 0 : index
    %c0_11 = arith.constant 0 : index
    %45 = vector.load %arg4[%c0_10, %c0_11] : memref<32x128xbf16, #tpu.memory_space<vmem>>, vector<32x128xbf16>
    %cst_12 = arith.constant dense<0.000000e+00> : vector<16x128xf32>
    %46 = tpu.matmul %44, %45, %cst_12 {dimension_numbers = #tpu.dot_dimension_numbers<[1], [0], [0], [1], [0, 0, 1, 1], [], []>} : vector<16x32xbf16>, vector<32x128xbf16>, vector<16x128xf32> -> vector<16x128xf32>
    %c0_13 = arith.constant 0 : index
    %c0_14 = arith.constant 0 : index
    %47 = vector.load %arg3[%c0_13, %c0_14] : memref<16x128xf32, #tpu.memory_space<vmem>>, vector<1x128xf32>
    %48 = vector.broadcast %47 : vector<1x128xf32> to vector<16x128xf32>
    %49 = arith.addf %46, %48 : vector<16x128xf32>
    %50 = vector.extract_strided_slice %49 {offsets = [0, 0], sizes = [16, 32], strides = [1, 1]} : vector<16x128xf32> to vector<16x32xf32>
    %51 = vector.extract_strided_slice %49 {offsets = [0, 32], sizes = [16, 32], strides = [1, 1]} : vector<16x128xf32> to vector<16x32xf32>
    %52 = vector.extract_strided_slice %49 {offsets = [0, 64], sizes = [16, 32], strides = [1, 1]} : vector<16x128xf32> to vector<16x32xf32>
    %c0_15 = arith.constant 0 : index
    %c0_16 = arith.constant 0 : index
    %53 = vector.load %arg1[%c0_15, %c0_16] : memref<16x16xf32, #tpu.memory_space<vmem>>, vector<16x16xf32>
    %54 = vector.extract_strided_slice %50 {offsets = [0, 0], sizes = [16, 16], strides = [1, 1]} : vector<16x32xf32> to vector<16x16xf32>
    %55 = vector.extract_strided_slice %50 {offsets = [0, 16], sizes = [16, 16], strides = [1, 1]} : vector<16x32xf32> to vector<16x16xf32>
    %56 = vector.shape_cast %54 : vector<16x16xf32> to vector<1x16x16xf32>
    %57 = vector.shape_cast %55 : vector<16x16xf32> to vector<1x16x16xf32>
    %58 = tpu.concatenate %56, %57 in 0 : vector<1x16x16xf32>, vector<1x16x16xf32> -> vector<2x16x16xf32>
    %59 = arith.truncf %58 : vector<2x16x16xf32> to vector<2x16x16xbf16>
    %60 = vector.extract_strided_slice %51 {offsets = [0, 0], sizes = [16, 16], strides = [1, 1]} : vector<16x32xf32> to vector<16x16xf32>
    %61 = vector.extract_strided_slice %51 {offsets = [0, 16], sizes = [16, 16], strides = [1, 1]} : vector<16x32xf32> to vector<16x16xf32>
    %62 = vector.shape_cast %60 : vector<16x16xf32> to vector<1x16x16xf32>
    %63 = vector.shape_cast %61 : vector<16x16xf32> to vector<1x16x16xf32>
    %64 = tpu.concatenate %62, %63 in 0 : vector<1x16x16xf32>, vector<1x16x16xf32> -> vector<2x16x16xf32>
    %65 = arith.truncf %64 : vector<2x16x16xf32> to vector<2x16x16xbf16>
    %66 = vector.extract_strided_slice %52 {offsets = [0, 0], sizes = [16, 16], strides = [1, 1]} : vector<16x32xf32> to vector<16x16xf32>
    %67 = vector.extract_strided_slice %52 {offsets = [0, 16], sizes = [16, 16], strides = [1, 1]} : vector<16x32xf32> to vector<16x16xf32>
    %68 = vector.shape_cast %66 : vector<16x16xf32> to vector<1x16x16xf32>
    %69 = vector.shape_cast %67 : vector<16x16xf32> to vector<1x16x16xf32>
    %70 = tpu.concatenate %68, %69 in 0 : vector<1x16x16xf32>, vector<1x16x16xf32> -> vector<2x16x16xf32>
    %71 = arith.truncf %70 : vector<2x16x16xf32> to vector<2x16x16xbf16>
    "tpu.trace_start"() <{level = 10 : i32, message = "hqd,hkd->hqk"}> : () -> ()
    %cst_17 = arith.constant dense<0.000000e+00> : vector<2x16x16xf32>
    %72 = tpu.matmul %59, %65, %cst_17 {dimension_numbers = #tpu.dot_dimension_numbers<[2], [2], [1], [1], [0, 0, 0, 1, 1, 1], [0], [0]>} : vector<2x16x16xbf16>, vector<2x16x16xbf16>, vector<2x16x16xf32> -> vector<2x16x16xf32>
    "tpu.trace_stop"() : () -> ()
    %cst_18 = arith.constant 2.500000e-01 : f32
    %73 = vector.broadcast %cst_18 : f32 to vector<2x16x16xf32>
    %74 = arith.mulf %72, %73 : vector<2x16x16xf32>
    %75 = vector.shape_cast %53 : vector<16x16xf32> to vector<1x16x16xf32>
    %76 = vector.broadcast %75 : vector<1x16x16xf32> to vector<2x16x16xf32>
    %77 = arith.addf %74, %76 : vector<2x16x16xf32>
    %cst_19 = arith.constant dense<0xFF800000> : vector<2x16xf32>
    %78 = vector.multi_reduction <maximumf>, %77, %cst_19 [2] : vector<2x16x16xf32> to vector<2x16xf32>
    %79 = vector.shape_cast %78 : vector<2x16xf32> to vector<2x16x1xf32>
    %80 = vector.broadcast %79 : vector<2x16x1xf32> to vector<2x16x16xf32>
    %81 = arith.subf %77, %80 : vector<2x16x16xf32>
    %82 = math.exp %81 : vector<2x16x16xf32>
    %cst_20 = arith.constant dense<0.000000e+00> : vector<2x16xf32>
    %83 = vector.multi_reduction <add>, %82, %cst_20 [2] : vector<2x16x16xf32> to vector<2x16xf32>
    %84 = vector.shape_cast %83 : vector<2x16xf32> to vector<2x16x1xf32>
    %85 = tpu.reciprocal %84 {approx = true} : vector<2x16x1xf32> -> vector<2x16x1xf32>
    %86 = vector.broadcast %85 : vector<2x16x1xf32> to vector<2x16x16xf32>
    %87 = arith.mulf %82, %86 : vector<2x16x16xf32>
    %88 = arith.truncf %87 : vector<2x16x16xf32> to vector<2x16x16xbf16>
    "tpu.trace_start"() <{level = 10 : i32, message = "hqk,hkd->hqd"}> : () -> ()
    %cst_21 = arith.constant dense<0.000000e+00> : vector<2x16x16xf32>
    %89 = tpu.matmul %88, %71, %cst_21 {dimension_numbers = #tpu.dot_dimension_numbers<[2], [1], [1], [2], [0, 0, 0, 1, 1, 2], [0], [0]>} : vector<2x16x16xbf16>, vector<2x16x16xbf16>, vector<2x16x16xf32> -> vector<2x16x16xf32>
    "tpu.trace_stop"() : () -> ()
    %90 = vector.extract_strided_slice %89 {offsets = [0, 0, 0], sizes = [1, 16, 16], strides = [1, 1, 1]} : vector<2x16x16xf32> to vector<1x16x16xf32>
    %91 = vector.shape_cast %90 : vector<1x16x16xf32> to vector<16x16xf32>
    %92 = vector.extract_strided_slice %89 {offsets = [1, 0, 0], sizes = [1, 16, 16], strides = [1, 1, 1]} : vector<2x16x16xf32> to vector<1x16x16xf32>
    %93 = vector.shape_cast %92 : vector<1x16x16xf32> to vector<16x16xf32>
    %94 = tpu.concatenate %91, %93 in 1 : vector<16x16xf32>, vector<16x16xf32> -> vector<16x32xf32>
    %95 = arith.truncf %94 : vector<16x32xf32> to vector<16x32xbf16>
    %c0_22 = arith.constant 0 : index
    %c0_23 = arith.constant 0 : index
    %96 = vector.load %arg5[%c0_22, %c0_23] : memref<32x32xbf16, #tpu.memory_space<vmem>>, vector<32x32xbf16>
    %cst_24 = arith.constant dense<0.000000e+00> : vector<16x32xf32>
    %97 = tpu.matmul %95, %96, %cst_24 {dimension_numbers = #tpu.dot_dimension_numbers<[1], [0], [0], [1], [0, 0, 1, 1], [], []>} : vector<16x32xbf16>, vector<32x32xbf16>, vector<16x32xf32> -> vector<16x32xf32>
    %c1 = arith.constant 1 : index
    %c0_25 = arith.constant 0 : index
    %98 = vector.load %arg3[%c1, %c0_25] : memref<16x128xf32, #tpu.memory_space<vmem>>, vector<1x32xf32>
    %99 = vector.broadcast %98 : vector<1x32xf32> to vector<16x32xf32>
    %100 = arith.addf %97, %99 : vector<16x32xf32>
    %101 = arith.addf %43, %100 : vector<16x32xf32>
    %c2 = arith.constant 2 : index
    %c0_26 = arith.constant 0 : index
    %102 = vector.load %arg3[%c2, %c0_26] : memref<16x128xf32, #tpu.memory_space<vmem>>, vector<1x32xf32>
    %c3 = arith.constant 3 : index
    %c0_27 = arith.constant 0 : index
    %103 = vector.load %arg3[%c3, %c0_27] : memref<16x128xf32, #tpu.memory_space<vmem>>, vector<1x32xf32>
    %cst_28 = arith.constant dense<0.000000e+00> : vector<16xf32>
    %104 = vector.multi_reduction <add>, %101, %cst_28 [1] : vector<16x32xf32> to vector<16xf32>
    %105 = vector.shape_cast %104 : vector<16xf32> to vector<16x1xf32>
    %cst_29 = arith.constant 3.200000e+01 : f32
    %106 = vector.broadcast %cst_29 : f32 to vector<16x1xf32>
    %107 = arith.divf %105, %106 : vector<16x1xf32>
    %108 = vector.broadcast %107 : vector<16x1xf32> to vector<16x32xf32>
    %109 = arith.subf %101, %108 : vector<16x32xf32>
    %110 = vector.broadcast %107 : vector<16x1xf32> to vector<16x32xf32>
    %111 = arith.subf %101, %110 : vector<16x32xf32>
    %112 = arith.mulf %109, %111 : vector<16x32xf32>
    %cst_30 = arith.constant dense<0.000000e+00> : vector<16xf32>
    %113 = vector.multi_reduction <add>, %112, %cst_30 [1] : vector<16x32xf32> to vector<16xf32>
    %114 = vector.shape_cast %113 : vector<16xf32> to vector<16x1xf32>
    %cst_31 = arith.constant 3.200000e+01 : f32
    %115 = vector.broadcast %cst_31 : f32 to vector<16x1xf32>
    %116 = arith.divf %114, %115 : vector<16x1xf32>
    %117 = vector.broadcast %107 : vector<16x1xf32> to vector<16x32xf32>
    %118 = arith.subf %101, %117 : vector<16x32xf32>
    %cst_32 = arith.constant 9.99999996E-13 : f32
    %119 = vector.broadcast %cst_32 : f32 to vector<16x1xf32>
    %120 = arith.addf %116, %119 : vector<16x1xf32>
    %121 = math.rsqrt %120 : vector<16x1xf32>
    %122 = vector.broadcast %121 : vector<16x1xf32> to vector<16x32xf32>
    %123 = arith.mulf %118, %122 : vector<16x32xf32>
    %124 = vector.broadcast %102 : vector<1x32xf32> to vector<16x32xf32>
    %125 = arith.mulf %123, %124 : vector<16x32xf32>
    %126 = vector.broadcast %103 : vector<1x32xf32> to vector<16x32xf32>
    %127 = arith.addf %125, %126 : vector<16x32xf32>
    %128 = arith.truncf %127 : vector<16x32xf32> to vector<16x32xbf16>
    %c0_33 = arith.constant 0 : index
    %c0_34 = arith.constant 0 : index
    %129 = vector.load %arg6[%c0_33, %c0_34] : memref<32x128xbf16, #tpu.memory_space<vmem>>, vector<32x128xbf16>
    %cst_35 = arith.constant dense<0.000000e+00> : vector<16x128xf32>
    %130 = tpu.matmul %128, %129, %cst_35 {dimension_numbers = #tpu.dot_dimension_numbers<[1], [0], [0], [1], [0, 0, 1, 1], [], []>} : vector<16x32xbf16>, vector<32x128xbf16>, vector<16x128xf32> -> vector<16x128xf32>
    %c4 = arith.constant 4 : index
    %c0_36 = arith.constant 0 : index
    %131 = vector.load %arg3[%c4, %c0_36] : memref<16x128xf32, #tpu.memory_space<vmem>>, vector<1x128xf32>
    %132 = vector.broadcast %131 : vector<1x128xf32> to vector<16x128xf32>
    %133 = arith.addf %130, %132 : vector<16x128xf32>
    %cst_37 = arith.constant 5.000000e-01 : f32
    %134 = vector.broadcast %cst_37 : f32 to vector<16x128xf32>
    %135 = arith.mulf %134, %133 : vector<16x128xf32>
    %cst_38 = arith.constant 4.471500e-02 : f32
    %136 = vector.broadcast %cst_38 : f32 to vector<16x128xf32>
    %137 = arith.mulf %136, %133 : vector<16x128xf32>
    %138 = arith.mulf %137, %133 : vector<16x128xf32>
    %139 = arith.mulf %138, %133 : vector<16x128xf32>
    %140 = arith.addf %133, %139 : vector<16x128xf32>
    %cst_39 = arith.constant 0.797884583 : f32
    %141 = vector.broadcast %cst_39 : f32 to vector<16x128xf32>
    %142 = arith.mulf %141, %140 : vector<16x128xf32>
    %143 = math.tanh %142 : vector<16x128xf32>
    %cst_40 = arith.constant 1.000000e+00 : f32
    %144 = vector.broadcast %cst_40 : f32 to vector<16x128xf32>
    %145 = arith.addf %144, %143 : vector<16x128xf32>
    %146 = arith.mulf %135, %145 : vector<16x128xf32>
    %147 = arith.truncf %146 : vector<16x128xf32> to vector<16x128xbf16>
    %c0_41 = arith.constant 0 : index
    %c0_42 = arith.constant 0 : index
    %148 = vector.load %arg7[%c0_41, %c0_42] : memref<128x32xbf16, #tpu.memory_space<vmem>>, vector<128x32xbf16>
    %cst_43 = arith.constant dense<0.000000e+00> : vector<16x32xf32>
    %149 = tpu.matmul %147, %148, %cst_43 {dimension_numbers = #tpu.dot_dimension_numbers<[1], [0], [0], [1], [0, 0, 1, 1], [], []>} : vector<16x128xbf16>, vector<128x32xbf16>, vector<16x32xf32> -> vector<16x32xf32>
    %c5 = arith.constant 5 : index
    %c0_44 = arith.constant 0 : index
    %150 = vector.load %arg3[%c5, %c0_44] : memref<16x128xf32, #tpu.memory_space<vmem>>, vector<1x32xf32>
    %151 = vector.broadcast %150 : vector<1x32xf32> to vector<16x32xf32>
    %152 = arith.addf %149, %151 : vector<16x32xf32>
    %153 = arith.addf %127, %152 : vector<16x32xf32>
    %c6 = arith.constant 6 : index
    %c0_45 = arith.constant 0 : index
    %154 = vector.load %arg3[%c6, %c0_45] : memref<16x128xf32, #tpu.memory_space<vmem>>, vector<1x32xf32>
    %c7 = arith.constant 7 : index
    %c0_46 = arith.constant 0 : index
    %155 = vector.load %arg3[%c7, %c0_46] : memref<16x128xf32, #tpu.memory_space<vmem>>, vector<1x32xf32>
    %cst_47 = arith.constant dense<0.000000e+00> : vector<16xf32>
    %156 = vector.multi_reduction <add>, %153, %cst_47 [1] : vector<16x32xf32> to vector<16xf32>
    %157 = vector.shape_cast %156 : vector<16xf32> to vector<16x1xf32>
    %cst_48 = arith.constant 3.200000e+01 : f32
    %158 = vector.broadcast %cst_48 : f32 to vector<16x1xf32>
    %159 = arith.divf %157, %158 : vector<16x1xf32>
    %160 = vector.broadcast %159 : vector<16x1xf32> to vector<16x32xf32>
    %161 = arith.subf %153, %160 : vector<16x32xf32>
    %162 = vector.broadcast %159 : vector<16x1xf32> to vector<16x32xf32>
    %163 = arith.subf %153, %162 : vector<16x32xf32>
    %164 = arith.mulf %161, %163 : vector<16x32xf32>
    %cst_49 = arith.constant dense<0.000000e+00> : vector<16xf32>
    %165 = vector.multi_reduction <add>, %164, %cst_49 [1] : vector<16x32xf32> to vector<16xf32>
    %166 = vector.shape_cast %165 : vector<16xf32> to vector<16x1xf32>
    %cst_50 = arith.constant 3.200000e+01 : f32
    %167 = vector.broadcast %cst_50 : f32 to vector<16x1xf32>
    %168 = arith.divf %166, %167 : vector<16x1xf32>
    %169 = vector.broadcast %159 : vector<16x1xf32> to vector<16x32xf32>
    %170 = arith.subf %153, %169 : vector<16x32xf32>
    %cst_51 = arith.constant 9.99999996E-13 : f32
    %171 = vector.broadcast %cst_51 : f32 to vector<16x1xf32>
    %172 = arith.addf %168, %171 : vector<16x1xf32>
    %173 = math.rsqrt %172 : vector<16x1xf32>
    %174 = vector.broadcast %173 : vector<16x1xf32> to vector<16x32xf32>
    %175 = arith.mulf %170, %174 : vector<16x32xf32>
    %176 = vector.broadcast %154 : vector<1x32xf32> to vector<16x32xf32>
    %177 = arith.mulf %175, %176 : vector<16x32xf32>
    %178 = vector.broadcast %155 : vector<1x32xf32> to vector<16x32xf32>
    %179 = arith.addf %177, %178 : vector<16x32xf32>
    %180 = arith.truncf %179 : vector<16x32xf32> to vector<16x32xbf16>
    %c0_52 = arith.constant 0 : index
    %c0_53 = arith.constant 0 : index
    %181 = vector.load %arg8[%c0_52, %c0_53] : memref<32x32xbf16, #tpu.memory_space<vmem>>, vector<32x32xbf16>
    %cst_54 = arith.constant dense<0.000000e+00> : vector<16x32xf32>
    %182 = tpu.matmul %180, %181, %cst_54 {dimension_numbers = #tpu.dot_dimension_numbers<[1], [0], [0], [1], [0, 0, 1, 1], [], []>} : vector<16x32xbf16>, vector<32x32xbf16>, vector<16x32xf32> -> vector<16x32xf32>
    %c8 = arith.constant 8 : index
    %c0_55 = arith.constant 0 : index
    %183 = vector.load %arg3[%c8, %c0_55] : memref<16x128xf32, #tpu.memory_space<vmem>>, vector<1x32xf32>
    %184 = vector.broadcast %183 : vector<1x32xf32> to vector<16x32xf32>
    %185 = arith.addf %182, %184 : vector<16x32xf32>
    %186 = math.tanh %185 : vector<16x32xf32>
    %187 = arith.truncf %186 : vector<16x32xf32> to vector<16x32xbf16>
    %c0_56 = arith.constant 0 : index
    %c0_57 = arith.constant 0 : index
    %188 = vector.load %arg9[%c0_56, %c0_57] : memref<32x128xbf16, #tpu.memory_space<vmem>>, vector<32x128xbf16>
    %cst_58 = arith.constant dense<0.000000e+00> : vector<16x128xf32>
    %189 = tpu.matmul %187, %188, %cst_58 {dimension_numbers = #tpu.dot_dimension_numbers<[1], [0], [0], [1], [0, 0, 1, 1], [], []>} : vector<16x32xbf16>, vector<32x128xbf16>, vector<16x128xf32> -> vector<16x128xf32>
    %c9 = arith.constant 9 : index
    %c0_59 = arith.constant 0 : index
    %190 = vector.load %arg3[%c9, %c0_59] : memref<16x128xf32, #tpu.memory_space<vmem>>, vector<1x128xf32>
    %191 = vector.broadcast %190 : vector<1x128xf32> to vector<16x128xf32>
    %192 = arith.addf %189, %191 : vector<16x128xf32>
    %c0_60 = arith.constant 0 : index
    %c0_61 = arith.constant 0 : index
    %193 = vector.load %arg10[%c0_60, %c0_61] : memref<16x128xf32, #tpu.memory_space<vmem>>, vector<16x128xf32>
    tpu.vector_store %arg10[%c0_60, %c0_61], %192 {strides = array<i32>} : memref<16x128xf32, #tpu.memory_space<vmem>>, vector<16x128xf32>,
    return
  }
}

</mosaic_0001>

<bundles_post_ra>
// kernel: bert_classifier.1
= control target key start
LH: loop header
LB: loop body
LE: loop exit
PB: predicated region body
PF: predicated region fallthrough
CT: control target
= control target key end

     0   :  { %v1007_v0 = vmov 1   ;;  %v1008_v1 = vmov 0   ;;  %v1009_v4 = vmov 2   ;;  %v36_v13 = vlaneseq  ;;  %s1012_s20 = smov 112   ;;  %s1013_s21 = smov 96   ;;  %s1265_s0 = inlined_call_operand.vmem [shape: s32[16,3], index: 0, kind: input, shape index: {}]   ;;  %s1266_s2 = inlined_call_operand.vmem [shape: bf16[128,32], index: 2, kind: input, shape index: {}]   ;;  %s1267_s3 = inlined_call_operand.vmem [shape: f32[16,128], index: 3, kind: input, shape index: {}]   ;;  %s1268_s4 = inlined_call_operand.vmem [shape: bf16[32,128], index: 4, kind: input, shape index: {}]   ;;  %s1269_s1 = inlined_call_operand.vmem [shape: f32[16,16], index: 1, kind: input, shape index: {}]   ;;  %s1270_s5 = inlined_call_operand.vmem [shape: bf16[32,32], index: 5, kind: input, shape index: {}]   ;;  %s1271_s6 = inlined_call_operand.vmem [shape: bf16[32,128], index: 6, kind: input, shape index: {}]   ;;  %s1272_s7 = inlined_call_operand.vmem [shape: bf16[128,32], index: 7, kind: input, shape index: {}]   ;;  %s1273_s8 = inlined_call_operand.vmem [shape: bf16[32,32], index: 8, kind: input, shape index: {}]   ;;  %s1274_s9 = inlined_call_operand.vmem [shape: bf16[32,128], index: 9, kind: input, shape index: {}]   ;;  %s1275_s10 = inlined_call_operand.vmem [shape: f32[16,128], index: 10, kind: output, shape index: {}]  }
   0x1   :  { %944 = vset.pattern.permute.xlu1 %v1007_v0  ;;  %943 = vset.pattern.permute.xlu0 %v1008_v1  ;;  %v38_v2 = vld [vmem:[%s1265_s0] sm:$0xff]  ;;  %v915_v3 = vld [vmem:[%s1266_s2 + $0x38] sm:$0xff]  ;;  %v914_v5 = vld [vmem:[%s1266_s2 + $0x30] sm:$0xff]  ;;  %v1010_v21 = vmov 1.0|1.0   ;;  %vm153_vm11 = vcmask 261120  }
   0x2   :  { %49 = vperm.xlu1 %944, %v38_v2   ;;  %41 = vperm.xlu0 %943, %v38_v2   ;;  %v39_v6 = vld [vmem:[%s1265_s0 + $0x8] sm:$0xff]  ;;  %v912_v8 = vld [vmem:[%s1266_s2 + $0x20] sm:$0xff]  ;;  %v911_v9 = vld [vmem:[%s1266_s2 + $0x18] sm:$0xff]  ;;  %v37_v15 = vand.u32 127, %v36_v13  ;;  %v1011_v26 = vmov 32.0   ;;  %s1014_s24 = smov 64  }
   0x3   :  { %945 = vset.pattern.permute.xlu2 %v1009_v4  ;;  %137 = vmatpush.bf16.msra.mxu0 %v915_v3  ;;  %v913_v7 = vld [vmem:[%s1266_s2 + $0x28] sm:$0xff]  ;;  %v910_v10 = vld [vmem:[%s1266_s2 + $0x10] sm:$0xff]  ;;  %v908_v12 = vld [vmem:[%s1266_s2] sm:$0xff]  ;;  %969 = vrcp.f32 %v1011_v26  ;;  %s1015_s29 = smov 16  }
   0x4   :  { %59 = vperm.xlu2 %945, %v38_v2   ;;  %v909_v11 = vld [vmem:[%s1266_s2 + $0x8] sm:$0xff]  ;;  %v916_v45 = vld [vmem:[%s1268_s4] sm:$0xff] }
   0x5   :  { %v917_v43 = vld [vmem:[%s1268_s4 + $0x8] sm:$0xff] }
   0x6   :  { %239 = vmatpush.bf16.msra.mxu1 %v917_v43  ;;  %v957_v0 = vld [vmem:[%s1267_s3 + $0xa] ss:$0 sm:$0xff] }
   0x7   :  { %138 = vmatpush.bf16.msra.mxu0 %v914_v5  ;;  %v958_v5 = vld [vmem:[%s1267_s3 + $0xb] ss:$0 sm:$0xff] }
   0x9   :  { %v970_v27 = vpop.eup %969 }
   0xa   :  { %52 = vperm.xlu1 %944, %v39_v6   ;;  %44 = vperm.xlu0 %943, %v39_v6   ;;  %v161_v28 = vmul.f32 32.0, %v970_v27  ;;  %vm165_vm12 = vweird.f32 %v970_v27 }
   0xb   :  { %139 = vmatpush.bf16.msra.mxu0 %v913_v7  ;;  %240 = vmatpush.bf16.msra.mxu1 %v916_v45 }
   0xc   :  { %62 = vperm.xlu2 %945, %v39_v6   ;;  %v162_v29 = vsub.f32 1.0, %v161_v28 }
   0xe   :  { %v163_v30 = vmul.f32 %v970_v27, %v162_v29 }
   0xf   :  { %140 = vmatpush.bf16.msra.mxu0 %v912_v8 }
  0x10   :  { %v164_v31 = vadd.f32 %v970_v27, %v163_v30 }
  0x12   :  { %956 = vset.pattern.permute.xlu0 %v1009_v4  ;;  %v1103_v32 = vsel %vm165_vm12, %v970_v27, %v164_v31 }
  0x13   :  { %141 = vmatpush.bf16.msra.mxu0 %v911_v9 }
  0x17   :  { %142 = vmatpush.bf16.msra.mxu0 %v910_v10 }
  0x1b   :  { %143 = vmatpush.bf16.msra.mxu0 %v909_v11  ;;  %v959_v11 = vld [vmem:[%s1267_s3] ss:$0 sm:$0xff] }
  0x1f   :  { %144 = vmatpush.bf16.msra.mxu0 %v908_v12 }
  0x5e   :  { %v60_v14 = vpop.permute.xlu2 %59 }
  0x5f   :  { %vm64_vm2 = vcmp.eq.s32.totalorder %v37_v15, %v60_v14 }
  0x66   :  { %v63_v18 = vpop.permute.xlu2 %62 }
  0x67   :  { %vm65_vm7 = vcmp.eq.s32.totalorder %v37_v15, %v63_v18 }
  0x74   :  { %v50_v16 = vpop.permute.xlu1 %49  ;;  %v42_v17 = vpop.permute.xlu0 %41 }
  0x75   :  { %vm54_vm0 = vcmp.eq.s32.totalorder %v37_v15, %v50_v16  ;;  %vm46_vm1 = vcmp.eq.s32.totalorder %v37_v15, %v42_v17 }
  0x76   :  { %vm56_vm3 = vmor %vm46_vm1, %vm54_vm0 }
  0x77   :  { %vm66_vm4 = vmor %vm56_vm3, %vm64_vm2  ;;  %vm268_vm3 = vcmask 130048  }
  0x7c   :  { %v53_v19 = vpop.permute.xlu1 %52  ;;  %v45_v20 = vpop.permute.xlu0 %44 }
  0x7d   :  { %vm55_vm5 = vcmp.eq.s32.totalorder %v37_v15, %v53_v19  ;;  %vm47_vm6 = vcmp.eq.s32.totalorder %v37_v15, %v45_v20 }
  0x7e   :  { %vm57_vm8 = vmor %vm47_vm6, %vm55_vm5 }
  0x7f   :  { %vm67_vm9 = vmor %vm57_vm8, %vm65_vm7 }
  0x80   :  { %vm825_vm10 = vmpackc.low %vm67_vm9, %vm66_vm4 }
  0x81   :  { %826 = vmatmul.msk.bf16.vlgmr.msra.gmra.mxu0 %vm825_vm10, %v1010_v21 }
  0xfe   :  { %v146_v22 = vpop.f32.mrf.mxu0 }
  0xff   :  { %v154_v23 = vsel %vm153_vm11, %v146_v22, 0.0 }
 0x100   :  { %155 = vadd.xlane.f32.xlu0 %v154_v23 }
 0x106   :  { %v148_v24 = vpop.f32.mrf.mxu0 }
 0x107   :  { %v157_v25 = vsel %vm153_vm11, %v148_v24, 0.0 }
 0x108   :  { %158 = vadd.xlane.f32.xlu1 %v157_v25 }
 0x173   :  { %v156_v33 = vpop.xlane.xlu0 %155 }
 0x174   :  { %v167_v34 = vmul.f32 %v1103_v32, %v156_v33  ;;  %v247_v33 = vld [vmem:[%s1269_s1] sm:$0xff] }
 0x176   :  { %v169_v35 = vsub.f32 %v146_v22, %v167_v34 }
 0x178   :  { %v171_v36 = vmul.f32 %v169_v35, %v169_v35 }
 0x17a   :  { %v173_v37 = vsel %vm153_vm11, %v171_v36, 0.0 }
 0x17b   :  { %174 = vadd.xlane.f32.xlu2 %v173_v37  ;;  %v159_v38 = vpop.xlane.xlu1 %158 }
 0x17c   :  { %v168_v39 = vmul.f32 %v1103_v32, %v159_v38 }
 0x17e   :  { %v170_v40 = vsub.f32 %v148_v24, %v168_v39 }
 0x180   :  { %v172_v41 = vmul.f32 %v170_v40, %v170_v40 }
 0x182   :  { %v176_v42 = vsel %vm153_vm11, %v172_v41, 0.0 }
 0x183   :  { %177 = vadd.xlane.f32.xlu2 %v176_v42 }
 0x1ee   :  { %v175_v44 = vpop.xlane.xlu2 %174 }
 0x1ef   :  { %v179_v46 = vmul.f32 %v175_v44, %v1103_v32 }
 0x1f1   :  { %v181_v47 = vadd.f32 1e-12, %v179_v46 }
 0x1f3   :  { %971 = vrsqrt.f32 %v181_v47  ;;  %vm189_vm14 = vweird.f32 %v181_v47 }
 0x1f6   :  { %v178_v48 = vpop.xlane.xlu2 %177 }
 0x1f7   :  { %v180_v49 = vmul.f32 %v178_v48, %v1103_v32 }
 0x1f9   :  { %v972_v50 = vpop.eup %971  ;;  %v182_v51 = vadd.f32 1e-12, %v180_v49 }
 0x1fa   :  { %v184_v52 = vmul.f32 %v972_v50, %v181_v47  ;;  %vm190_vm13 = vweird.f32 %v972_v50  ;;  %v248_v47 = vld [vmem:[%s1269_s1 + $0x8] sm:$0xff] }
 0x1fb   :  { %973 = vrsqrt.f32 %v182_v51  ;;  %vm191_vm15 = vmor %vm189_vm14, %vm190_vm13  ;;  %vm199_vm1 = vweird.f32 %v182_v51 }
 0x1fc   :  { %v185_v53 = vmul.f32 %v972_v50, %v184_v52 }
 0x1fe   :  { %v186_v54 = vmul.f32 0.5, %v185_v53 }
 0x200   :  { %v187_v55 = vsub.f32 1.5, %v186_v54 }
 0x201   :  { %v974_v56 = vpop.eup %973 }
 0x202   :  { %v188_v57 = vmul.f32 %v972_v50, %v187_v55  ;;  %v194_v58 = vmul.f32 %v974_v56, %v182_v51  ;;  %vm200_vm0 = vweird.f32 %v974_v56 }
 0x203   :  { %vm201_vm2 = vmor %vm199_vm1, %vm200_vm0 }
 0x204   :  { %v195_v59 = vmul.f32 %v974_v56, %v194_v58  ;;  %v192_v60 = vsel %vm191_vm15, %v972_v50, %v188_v57 }
 0x205   :  { %v203_v63 = vmul.f32 %v192_v60, %v169_v35 }
 0x206   :  { %v196_v61 = vmul.f32 0.5, %v195_v59 }
 0x207   :  { %v206_v4 = vmul.f32 %v957_v0, %v203_v63 }
 0x208   :  { %v197_v62 = vsub.f32 1.5, %v196_v61 }
 0x209   :  { %v1123_v7 = vadd.f32 %v958_v5, %v206_v4 }
 0x20a   :  { %v198_v1 = vmul.f32 %v974_v56, %v197_v62 }
 0x20c   :  { %v202_v2 = vsel %vm201_vm2, %v974_v56, %v198_v1 }
 0x20d   :  { %v204_v3 = vmul.f32 %v202_v2, %v170_v40 }
 0x20f   :  { %v207_v6 = vmul.f32 %v957_v0, %v204_v3 }
 0x211   :  { %v1125_v8 = vadd.f32 %v958_v5, %v207_v6 }
 0x213   :  { %v211_v9 = vpack.c.bf16 %v1125_v8, %v1123_v7 }
 0x215   :  { %835 = vmatmul.msk.bf16.vlgmr.msra.gmra.mxu1 %vm153_vm11, %v211_v9 }
 0x292   :  { %v242_v10 = vpop.f32.mrf.mxu1 }
 0x293   :  { %v243_v12 = vadd.f32 %v959_v11, %v242_v10 }
 0x295   :  { %v257_v14 = vpack.c.bf16 %v243_v12, %v243_v12 }
 0x297   :  { %v263_v18 = vunpack.c.l.b16 %v257_v14 }
 0x29a   :  { %v244_v13 = vpop.f32.mrf.mxu1 }
 0x29b   :  { %v245_v15 = vadd.f32 %v959_v11, %v244_v13 }
 0x29d   :  { %v258_v16 = vpack.c.bf16 %v245_v15, %v245_v15  ;;  %v946_v17 = vpack.i.bf16 %v245_v15, %v243_v12 }
 0x29f   :  { %v264_v19 = vunpack.c.l.b16 %v258_v16  ;;  %947 = vrot.lane.b32.xlu0 %v946_v17, %s1012_s20 }
 0x2a1   :  { %v1133_v20 = vpack.c.b16 %v264_v19, %v263_v18 }
 0x2a3   :  { %266 = vrot.lane.b32.xlu2 %v1133_v20, %s1013_s21 }
 0x2fd   :  { %v267_v21 = vpop.permute.xlu2 %266 }
 0x2fe   :  { %v273_v22 = vsel %vm268_vm3, %v267_v21, 0 }
 0x2ff   :  { %282 = vmatpush.bf16.xpose.msra.mxu2 %v273_v22 }
 0x306   :  { %836 = vmatmul.msk.bf16.vlgmr.msra.gmra.mxu2 %vm268_vm3, %v1133_v20 }
 0x311   :  { %v948_v23 = vpop.permute.xlu0 %947 }
 0x312   :  { %v950_v24 = vunpack.i.h.bf16 %v948_v23  ;;  %v949_v25 = vunpack.i.l.bf16 %v948_v23 }
 0x314   :  { %v260_v26 = vpack.c.bf16 %v950_v24, %v950_v24  ;;  %v259_v27 = vpack.c.bf16 %v949_v25, %v949_v25 }
 0x316   :  { %v292_v28 = vunpack.c.l.b16 %v260_v26  ;;  %v291_v29 = vunpack.c.l.b16 %v259_v27 }
 0x318   :  { %v293_v30 = vpack.c.b16 %v292_v28, %v291_v29 }
 0x31a   :  { %294 = vrot.lane.b32.xlu1 %v293_v30, %s1013_s21 }
 0x389   :  { %v284_v31 = vpop.f32.mrf.mxu2 }
 0x38a   :  { %v316_v34 = vmul.f32 0.25, %v284_v31 }
 0x38c   :  { %v295_v35 = vpop.permute.xlu1 %294  ;;  %v320_v36 = vadd.f32 %v316_v34, %v247_v33 }
 0x38d   :  { %v300_v37 = vsel %vm268_vm3, %v295_v35, 0  ;;  %v919_v35 = vld [vmem:[%s1270_s5 + $0x8] sm:$0xff] }
 0x38e   :  { %309 = vmatpush.bf16.xpose.msra.mxu3 %v300_v37  ;;  %v324_v38 = vsel %vm268_vm3, %v320_v36, -inf }
 0x38f   :  { %325 = vmax.xlane.f32.xlu2 %v324_v38 }
 0x391   :  { %v286_v43 = vpop.f32.mrf.mxu2 }
 0x392   :  { %v317_v45 = vmul.f32 0.25, %v286_v43 }
 0x394   :  { %v321_v50 = vadd.f32 %v317_v45, %v248_v47 }
 0x395   :  { %837 = vmatmul.msk.bf16.vlgmr.msra.gmra.mxu3 %vm268_vm3, %v293_v30 }
 0x396   :  { %v327_v53 = vsel %vm268_vm3, %v321_v50, -inf  ;;  %460 = vmatpush.bf16.msrb.mxu3 %v919_v35  ;;  %v929_v35 = vld [vmem:[%s1272_s7 + $0x38] sm:$0xff] }
 0x3a7   :  { %402 = vrot.lane.b32.xlu2 %v293_v30, %s1014_s24 }
 0x402   :  { %v326_v39 = vpop.xlane.xlu2 %325 }
 0x403   :  { %v336_v56 = vsub.f32 %v320_v36, %v326_v39  ;;  %v918_v36 = vld [vmem:[%s1270_s5] sm:$0xff] }
 0x404   :  { %461 = vmatpush.bf16.msrb.mxu3 %v918_v36  ;;  %v928_v36 = vld [vmem:[%s1272_s7 + $0x30] sm:$0xff] }
 0x405   :  { %v340_v58 = vmul.f32 1.442695, %v336_v56 }
 0x40a   :  { %v403_v40 = vpop.permute.xlu2 %402 }
 0x40b   :  { %415 = vmatpush.bf16.msrb.mxu2 %v403_v40 }
 0x40f   :  { %643 = vmatpush.bf16.msra.mxu2 %v929_v35 }
 0x413   :  { %644 = vmatpush.bf16.msra.mxu2 %v928_v36 }
 0x418   :  { %v311_v41 = vpop.f32.mrf.mxu3 }
 0x419   :  { %v318_v42 = vmul.f32 0.25, %v311_v41 }
 0x41b   :  { %v322_v44 = vadd.f32 %v318_v42, %v247_v33 }
 0x41d   :  { %v330_v46 = vsel %vm268_vm3, %v322_v44, -inf }
 0x41e   :  { %331 = vmax.xlane.f32.xlu0 %v330_v46 }
 0x420   :  { %v313_v48 = vpop.f32.mrf.mxu3 }
 0x421   :  { %v319_v49 = vmul.f32 0.25, %v313_v48  ;;  %v960_v48 = vld [vmem:[%s1267_s3 + $0x1] ss:$0 sm:$0xff] }
 0x423   :  { %v323_v51 = vadd.f32 %v319_v49, %v248_v47 }
 0x425   :  { %v333_v52 = vsel %vm268_vm3, %v323_v51, -inf }
 0x426   :  { %334 = vmax.xlane.f32.xlu1 %v333_v52  ;;  %328 = vmax.xlane.f32.xlu0 %v327_v53 }
 0x491   :  { %v332_v54 = vpop.xlane.xlu0 %331 }
 0x492   :  { %v338_v55 = vsub.f32 %v322_v44, %v332_v54 }
 0x494   :  { %v344_v57 = vmul.f32 1.442695, %v338_v55 }
 0x496   :  { %975 = vpow2.f32 %v344_v57 }
 0x497   :  { %977 = vpow2.f32 %v340_v58 }
 0x499   :  { %v335_v59 = vpop.xlane.xlu1 %334  ;;  %v329_v60 = vpop.xlane.xlu0 %328 }
 0x49a   :  { %v339_v61 = vsub.f32 %v323_v51, %v335_v59  ;;  %v337_v0 = vsub.f32 %v321_v50, %v329_v60 }
 0x49c   :  { %v976_v62 = vpop.eup %975  ;;  %v346_v63 = vmul.f32 1.442695, %v339_v61  ;;  %v342_v2 = vmul.f32 1.442695, %v337_v0 }
 0x49d   :  { %v354_v1 = vsel %vm268_vm3, %v976_v62, 0.0  ;;  %v978_v3 = vpop.eup %977 }
 0x49e   :  { %979 = vpow2.f32 %v346_v63  ;;  %355 = vadd.xlane.f32.xlu1 %v354_v1  ;;  %v348_v5 = vsel %vm268_vm3, %v978_v3, 0.0 }
 0x49f   :  { %981 = vpow2.f32 %v342_v2 }
 0x4a4   :  { %v980_v4 = vpop.eup %979 }
 0x4a5   :  { %v357_v6 = vsel %vm268_vm3, %v980_v4, 0.0  ;;  %v982_v9 = vpop.eup %981 }
 0x4a6   :  { %349 = vadd.xlane.f32.xlu1 %v348_v5  ;;  %358 = vadd.xlane.f32.xlu0 %v357_v6  ;;  %v351_v10 = vsel %vm268_vm3, %v982_v9, 0.0 }
 0x4ae   :  { %352 = vadd.xlane.f32.xlu0 %v351_v10 }
 0x4bf   :  { %377 = vrot.lane.b32.xlu1 %v1133_v20, %s1014_s24 }
 0x511   :  { %v356_v11 = vpop.xlane.xlu1 %355 }
 0x512   :  { %983 = vrcp.f32 %v356_v11 }
 0x518   :  { %v984_v13 = vpop.eup %983 }
 0x519   :  { %v359_v12 = vpop.xlane.xlu0 %358  ;;  %v350_v14 = vpop.xlane.xlu1 %349  ;;  %v366_v15 = vmul.f32 %v984_v13, %v976_v62 }
 0x51a   :  { %985 = vrcp.f32 %v359_v12 }
 0x51b   :  { %987 = vrcp.f32 %v350_v14  ;;  %v370_v18 = vpack.c.bf16 %v366_v15, %v366_v15 }
 0x51d   :  { %v399_v23 = vunpack.c.l.b16 %v370_v18 }
 0x520   :  { %v986_v16 = vpop.eup %985 }
 0x521   :  { %v353_v17 = vpop.xlane.xlu0 %352  ;;  %v367_v19 = vmul.f32 %v986_v16, %v980_v4  ;;  %v988_v22 = vpop.eup %987  ;;  %v920_v4 = vld [vmem:[%s1271_s6] sm:$0xff] }
 0x522   :  { %989 = vrcp.f32 %v353_v17  ;;  %v364_v20 = vmul.f32 %v988_v22, %v978_v3 }
 0x523   :  { %v371_v21 = vpack.c.bf16 %v367_v19, %v367_v19 }
 0x524   :  { %v368_v29 = vpack.c.bf16 %v364_v20, %v364_v20 }
 0x525   :  { %v400_v24 = vunpack.c.l.b16 %v371_v21 }
 0x526   :  { %v374_v31 = vunpack.c.l.b16 %v368_v29 }
 0x527   :  { %v401_v26 = vpack.c.b16 %v400_v24, %v399_v23  ;;  %v961_v24 = vld [vmem:[%s1267_s3 + $0x2] ss:$0 sm:$0xff] }
 0x528   :  { %v990_v25 = vpop.eup %989 }
 0x529   :  { %v365_v27 = vmul.f32 %v990_v25, %v982_v9  ;;  %839 = vmatmul.msk.bf16.vlgmr.msrb.gmra.mxu2 %vm268_vm3, %v401_v26 }
 0x52b   :  { %v369_v28 = vpack.c.bf16 %v365_v27, %v365_v27  ;;  %v962_v27 = vld [vmem:[%s1267_s3 + $0x3] ss:$0 sm:$0xff] }
 0x52d   :  { %v375_v30 = vunpack.c.l.b16 %v369_v28 }
 0x52f   :  { %v376_v34 = vpack.c.b16 %v375_v30, %v374_v31 }
 0x531   :  { %v378_v33 = vpop.permute.xlu1 %377 }
 0x532   :  { %390 = vmatpush.bf16.msrb.mxu1 %v378_v33 }
 0x535   :  { %838 = vmatmul.msk.bf16.vlgmr.msrb.gmra.mxu1 %vm268_vm3, %v376_v34 }
 0x5ac   :  { %v417_v37 = vpop.f32.mrf.mxu2 }
 0x5b2   :  { %v392_v40 = vpop.f32.mrf.mxu1 }
 0x5b4   :  { %v419_v38 = vpop.f32.mrf.mxu2 }
 0x5b5   :  { %v951_v39 = vpack.i.bf16 %v419_v38, %v417_v37  ;;  %v927_v37 = vld [vmem:[%s1272_s7 + $0x28] sm:$0xff]  ;;  %v926_v38 = vld [vmem:[%s1272_s7 + $0x20] sm:$0xff] }
 0x5b6   :  { %645 = vmatpush.bf16.msra.mxu2 %v927_v37 }
 0x5b7   :  { %952 = vrot.lane.b32.xlu0 %v951_v39, %s1015_s29  ;;  %v925_v39 = vld [vmem:[%s1272_s7 + $0x18] sm:$0xff] }
 0x5ba   :  { %v394_v44 = vpop.f32.mrf.mxu1  ;;  %646 = vmatpush.bf16.msra.mxu2 %v926_v38 }
 0x5be   :  { %647 = vmatpush.bf16.msra.mxu2 %v925_v39 }
 0x629   :  { %v953_v41 = vpop.permute.xlu0 %952 }
 0x62a   :  { %v955_v42 = vunpack.i.h.bf16 %v953_v41  ;;  %v954_v43 = vunpack.i.l.bf16 %v953_v41  ;;  %v923_v41 = vld [vmem:[%s1272_s7 + $0x8] sm:$0xff] }
 0x62c   :  { %v431_v45 = vsel %vm268_vm3, %v394_v44, %v955_v42  ;;  %v430_v46 = vsel %vm268_vm3, %v392_v40, %v954_v43  ;;  %v924_v40 = vld [vmem:[%s1272_s7 + $0x10] sm:$0xff]  ;;  %v922_v42 = vld [vmem:[%s1272_s7] sm:$0xff] }
 0x62d   :  { %v432_v47 = vpack.c.bf16 %v431_v45, %v430_v46  ;;  %648 = vmatpush.bf16.msra.mxu2 %v924_v40  ;;  %v963_v43 = vld [vmem:[%s1267_s3 + $0x4] ss:$0 sm:$0xff] }
 0x62f   :  { %848 = vmatmul.msk.bf16.vlgmr.msrb.gmra.mxu3 %vm153_vm11, %v432_v47 }
 0x631   :  { %649 = vmatpush.bf16.msra.mxu2 %v923_v41 }
 0x635   :  { %650 = vmatpush.bf16.msra.mxu2 %v922_v42 }
 0x6b2   :  { %v463_v49 = vpop.f32.mrf.mxu3 }
 0x6b3   :  { %v464_v50 = vadd.f32 %v960_v48, %v463_v49 }
 0x6b5   :  { %v468_v51 = vadd.f32 %v464_v50, %v1123_v7 }
 0x6b7   :  { %v472_v52 = vsel %vm153_vm11, %v468_v51, 0.0 }
 0x6b8   :  { %473 = vadd.xlane.f32.xlu2 %v472_v52 }
 0x6ba   :  { %v465_v53 = vpop.f32.mrf.mxu3 }
 0x6bb   :  { %v466_v54 = vadd.f32 %v960_v48, %v465_v53 }
 0x6bd   :  { %v469_v55 = vadd.f32 %v466_v54, %v1125_v8  ;;  %v921_v8 = vld [vmem:[%s1271_s6 + $0x8] sm:$0xff] }
 0x6be   :  { %550 = vmatpush.bf16.msra.mxu1 %v921_v8  ;;  %v964_v8 = vld [vmem:[%s1267_s3 + $0x5] ss:$0 sm:$0xff] }
 0x6bf   :  { %v475_v56 = vsel %vm153_vm11, %v469_v55, 0.0 }
 0x6c0   :  { %476 = vadd.xlane.f32.xlu0 %v475_v56 }
 0x6c2   :  { %551 = vmatpush.bf16.msra.mxu1 %v920_v4 }
 0x72b   :  { %v474_v57 = vpop.xlane.xlu2 %473 }
 0x72c   :  { %v478_v58 = vmul.f32 %v474_v57, %v1103_v32 }
 0x72e   :  { %v480_v59 = vsub.f32 %v468_v51, %v478_v58 }
 0x730   :  { %v482_v60 = vmul.f32 %v480_v59, %v480_v59 }
 0x732   :  { %v484_v61 = vsel %vm153_vm11, %v482_v60, 0.0 }
 0x733   :  { %v477_v62 = vpop.xlane.xlu0 %476  ;;  %485 = vadd.xlane.f32.xlu1 %v484_v61 }
 0x734   :  { %v479_v7 = vmul.f32 %v477_v62, %v1103_v32 }
 0x736   :  { %v481_v63 = vsub.f32 %v469_v55, %v479_v7 }
 0x738   :  { %v483_v0 = vmul.f32 %v481_v63, %v481_v63 }
 0x73a   :  { %v487_v1 = vsel %vm153_vm11, %v483_v0, 0.0 }
 0x73b   :  { %488 = vadd.xlane.f32.xlu2 %v487_v1 }
 0x7a6   :  { %v486_v2 = vpop.xlane.xlu1 %485 }
 0x7a7   :  { %v490_v3 = vmul.f32 %v486_v2, %v1103_v32 }
 0x7a9   :  { %v492_v5 = vadd.f32 1e-12, %v490_v3 }
 0x7ab   :  { %991 = vrsqrt.f32 %v492_v5  ;;  %vm500_vm5 = vweird.f32 %v492_v5 }
 0x7ae   :  { %v489_v6 = vpop.xlane.xlu2 %488 }
 0x7af   :  { %v491_v9 = vmul.f32 %v489_v6, %v1103_v32 }
 0x7b1   :  { %v992_v10 = vpop.eup %991  ;;  %v493_v11 = vadd.f32 1e-12, %v491_v9 }
 0x7b2   :  { %v495_v12 = vmul.f32 %v992_v10, %v492_v5  ;;  %vm501_vm4 = vweird.f32 %v992_v10 }
 0x7b3   :  { %993 = vrsqrt.f32 %v493_v11  ;;  %vm502_vm6 = vmor %vm500_vm5, %vm501_vm4  ;;  %vm510_vm8 = vweird.f32 %v493_v11 }
 0x7b4   :  { %v496_v13 = vmul.f32 %v992_v10, %v495_v12 }
 0x7b6   :  { %v497_v14 = vmul.f32 0.5, %v496_v13 }
 0x7b8   :  { %v498_v15 = vsub.f32 1.5, %v497_v14 }
 0x7b9   :  { %v994_v16 = vpop.eup %993 }
 0x7ba   :  { %v499_v17 = vmul.f32 %v992_v10, %v498_v15  ;;  %v505_v18 = vmul.f32 %v994_v16, %v493_v11  ;;  %vm511_vm7 = vweird.f32 %v994_v16 }
 0x7bb   :  { %vm512_vm9 = vmor %vm510_vm8, %vm511_vm7 }
 0x7bc   :  { %v506_v19 = vmul.f32 %v994_v16, %v505_v18  ;;  %v503_v21 = vsel %vm502_vm6, %v992_v10, %v499_v17 }
 0x7bd   :  { %v514_v25 = vmul.f32 %v503_v21, %v480_v59 }
 0x7be   :  { %v507_v22 = vmul.f32 0.5, %v506_v19 }
 0x7bf   :  { %v517_v28 = vmul.f32 %v961_v24, %v514_v25 }
 0x7c0   :  { %v508_v23 = vsub.f32 1.5, %v507_v22 }
 0x7c1   :  { %v520_v31 = vadd.f32 %v962_v27, %v517_v28 }
 0x7c2   :  { %v509_v26 = vmul.f32 %v994_v16, %v508_v23  ;;  %v931_v23 = vld [vmem:[%s1273_s8 + $0x8] sm:$0xff] }
 0x7c3   :  { %739 = vmatpush.bf16.msra.mxu3 %v931_v23 }
 0x7c4   :  { %v513_v20 = vsel %vm512_vm9, %v994_v16, %v509_v26  ;;  %v930_v26 = vld [vmem:[%s1273_s8] sm:$0xff] }
 0x7c5   :  { %v515_v29 = vmul.f32 %v513_v20, %v481_v63 }
 0x7c7   :  { %v518_v30 = vmul.f32 %v961_v24, %v515_v29  ;;  %740 = vmatpush.bf16.msra.mxu3 %v930_v26 }
 0x7c9   :  { %v521_v33 = vadd.f32 %v962_v27, %v518_v30 }
 0x7cb   :  { %v522_v34 = vpack.c.bf16 %v521_v33, %v520_v31 }
 0x7cd   :  { %857 = vmatmul.msk.bf16.vlgmr.msra.gmra.mxu1 %vm153_vm11, %v522_v34 }
 0x84a   :  { %v553_v44 = vpop.f32.mrf.mxu1 }
 0x84b   :  { %v554_v45 = vadd.f32 %v963_v43, %v553_v44 }
 0x84d   :  { %v560_v46 = vmul.f32 0.044715, %v554_v45  ;;  %v558_v61 = vmul.f32 0.5, %v554_v45 }
 0x84f   :  { %v562_v47 = vmul.f32 %v560_v46, %v554_v45  ;;  %v966_v46 = vld [vmem:[%s1267_s3 + $0x7] ss:$0 sm:$0xff] }
 0x851   :  { %v564_v48 = vmul.f32 %v562_v47, %v554_v45 }
 0x852   :  { %v555_v49 = vpop.f32.mrf.mxu1 }
 0x853   :  { %v566_v50 = vadd.f32 %v564_v48, %v554_v45  ;;  %v556_v51 = vadd.f32 %v963_v43, %v555_v49 }
 0x855   :  { %v561_v52 = vmul.f32 0.044715, %v556_v51  ;;  %v568_v53 = vmul.f32 0.7978846, %v566_v50  ;;  %v559_v62 = vmul.f32 0.5, %v556_v51 }
 0x857   :  { %v563_v54 = vmul.f32 %v561_v52, %v556_v51  ;;  %995 = vtanh.f32 %v568_v53  ;;  %v933_v53 = vld [vmem:[%s1274_s9 + $0x8] sm:$0xff] }
 0x858   :  { %777 = vmatpush.bf16.msrb.mxu0 %v933_v53 }
 0x859   :  { %v565_v55 = vmul.f32 %v563_v54, %v556_v51  ;;  %v932_v54 = vld [vmem:[%s1274_s9] sm:$0xff] }
 0x85b   :  { %v567_v56 = vadd.f32 %v565_v55, %v556_v51 }
 0x85c   :  { %778 = vmatpush.bf16.msrb.mxu0 %v932_v54 }
 0x85d   :  { %v569_v57 = vmul.f32 0.7978846, %v567_v56  ;;  %v996_v58 = vpop.eup %995  ;;  %v967_v56 = vld [vmem:[%s1267_s3 + $0x8] ss:$0 sm:$0xff] }
 0x85e   :  { %v572_v59 = vadd.f32 1.0, %v996_v58 }
 0x85f   :  { %997 = vtanh.f32 %v569_v57 }
 0x860   :  { %v574_v63 = vmul.f32 %v572_v59, %v558_v61 }
 0x865   :  { %v998_v60 = vpop.eup %997 }
 0x866   :  { %v573_v7 = vadd.f32 1.0, %v998_v60 }
 0x868   :  { %v575_v0 = vmul.f32 %v573_v7, %v559_v62  ;;  %v968_v7 = vld [vmem:[%s1267_s3 + $0x9] ss:$0 sm:$0xff] }
 0x86a   :  { %v576_v1 = vpack.c.bf16 %v575_v0, %v574_v63 }
 0x86c   :  { %651 = vmatmul.bf16.vlgmr.msra.gmra.mxu2 %v576_v1 }
 0x8ef   :  { %v652_v2 = vpop.f32.mrf.mxu2 }
 0x8f0   :  { %v653_v3 = vadd.f32 %v964_v8, %v652_v2 }
 0x8f2   :  { %v657_v4 = vadd.f32 %v653_v3, %v520_v31 }
 0x8f4   :  { %v661_v5 = vsel %vm153_vm11, %v657_v4, 0.0 }
 0x8f5   :  { %662 = vadd.xlane.f32.xlu2 %v661_v5 }
 0x8f7   :  { %v654_v6 = vpop.f32.mrf.mxu2 }
 0x8f8   :  { %v655_v9 = vadd.f32 %v964_v8, %v654_v6 }
 0x8fa   :  { %v658_v10 = vadd.f32 %v655_v9, %v521_v33 }
 0x8fc   :  { %v664_v11 = vsel %vm153_vm11, %v658_v10, 0.0 }
 0x8fd   :  { %665 = vadd.xlane.f32.xlu0 %v664_v11 }
 0x968   :  { %v663_v12 = vpop.xlane.xlu2 %662 }
 0x969   :  { %v667_v13 = vmul.f32 %v663_v12, %v1103_v32 }
 0x96b   :  { %v669_v14 = vsub.f32 %v657_v4, %v667_v13 }
 0x96d   :  { %v671_v15 = vmul.f32 %v669_v14, %v669_v14 }
 0x96f   :  { %v673_v16 = vsel %vm153_vm11, %v671_v15, 0.0 }
 0x970   :  { %v666_v17 = vpop.xlane.xlu0 %665  ;;  %674 = vadd.xlane.f32.xlu1 %v673_v16 }
 0x971   :  { %v668_v18 = vmul.f32 %v666_v17, %v1103_v32 }
 0x973   :  { %v670_v19 = vsub.f32 %v658_v10, %v668_v18 }
 0x975   :  { %v672_v21 = vmul.f32 %v670_v19, %v670_v19 }
 0x977   :  { %v676_v22 = vsel %vm153_vm11, %v672_v21, 0.0 }
 0x978   :  { %677 = vadd.xlane.f32.xlu2 %v676_v22 }
 0x9e3   :  { %v675_v24 = vpop.xlane.xlu1 %674 }
 0x9e4   :  { %v679_v25 = vmul.f32 %v675_v24, %v1103_v32 }
 0x9e6   :  { %v681_v20 = vadd.f32 1e-12, %v679_v25 }
 0x9e8   :  { %999 = vrsqrt.f32 %v681_v20  ;;  %vm689_vm12 = vweird.f32 %v681_v20 }
 0x9eb   :  { %v678_v27 = vpop.xlane.xlu2 %677 }
 0x9ec   :  { %v680_v28 = vmul.f32 %v678_v27, %v1103_v32  ;;  %v965_v32 = vld [vmem:[%s1267_s3 + $0x6] ss:$0 sm:$0xff] }
 0x9ee   :  { %v1000_v29 = vpop.eup %999  ;;  %v682_v30 = vadd.f32 1e-12, %v680_v28 }
 0x9ef   :  { %v684_v31 = vmul.f32 %v1000_v29, %v681_v20  ;;  %vm690_vm10 = vweird.f32 %v1000_v29 }
 0x9f0   :  { %1001 = vrsqrt.f32 %v682_v30  ;;  %vm691_vm13 = vmor %vm689_vm12, %vm690_vm10  ;;  %vm699_vm15 = vweird.f32 %v682_v30 }
 0x9f1   :  { %v685_v33 = vmul.f32 %v1000_v29, %v684_v31 }
 0x9f3   :  { %v686_v34 = vmul.f32 0.5, %v685_v33 }
 0x9f5   :  { %v687_v35 = vsub.f32 1.5, %v686_v34 }
 0x9f6   :  { %v1002_v36 = vpop.eup %1001 }
 0x9f7   :  { %v688_v37 = vmul.f32 %v1000_v29, %v687_v35  ;;  %v694_v38 = vmul.f32 %v1002_v36, %v682_v30  ;;  %vm700_vm14 = vweird.f32 %v1002_v36 }
 0x9f8   :  { %vm701_vm0 = vmor %vm699_vm15, %vm700_vm14 }
 0x9f9   :  { %v695_v39 = vmul.f32 %v1002_v36, %v694_v38  ;;  %v692_v40 = vsel %vm691_vm13, %v1000_v29, %v688_v37 }
 0x9fa   :  { %v703_v43 = vmul.f32 %v692_v40, %v669_v14 }
 0x9fb   :  { %v696_v41 = vmul.f32 0.5, %v695_v39 }
 0x9fc   :  { %v706_v47 = vmul.f32 %v965_v32, %v703_v43 }
 0x9fd   :  { %v697_v42 = vsub.f32 1.5, %v696_v41 }
 0x9fe   :  { %v709_v50 = vadd.f32 %v966_v46, %v706_v47 }
 0x9ff   :  { %v698_v44 = vmul.f32 %v1002_v36, %v697_v42 }
 0xa01   :  { %v702_v45 = vsel %vm701_vm0, %v1002_v36, %v698_v44 }
 0xa02   :  { %v704_v48 = vmul.f32 %v702_v45, %v670_v19 }
 0xa04   :  { %v707_v49 = vmul.f32 %v965_v32, %v704_v48 }
 0xa06   :  { %v710_v51 = vadd.f32 %v966_v46, %v707_v49 }
 0xa08   :  { %v711_v52 = vpack.c.bf16 %v710_v51, %v709_v50 }
 0xa0a   :  { %898 = vmatmul.msk.bf16.vlgmr.msra.gmra.mxu3 %vm153_vm11, %v711_v52 }
 0xa8d   :  { %v742_v55 = vpop.f32.mrf.mxu3 }
 0xa8e   :  { %v743_v57 = vadd.f32 %v967_v56, %v742_v55 }
 0xa90   :  { %1003 = vtanh.f32 %v743_v57 }
 0xa95   :  { %v744_v58 = vpop.f32.mrf.mxu3 }
 0xa96   :  { %v745_v59 = vadd.f32 %v967_v56, %v744_v58  ;;  %v1004_v60 = vpop.eup %1003 }
 0xa98   :  { %1005 = vtanh.f32 %v745_v59 }
 0xa9e   :  { %v1006_v61 = vpop.eup %1005 }
 0xa9f   :  { %v749_v62 = vpack.c.bf16 %v1006_v61, %v1004_v60 }
 0xaa1   :  { %907 = vmatmul.msk.bf16.vlgmr.msrb.gmra.mxu0 %vm153_vm11, %v749_v62 }
 0xb1e   :  { %v780_v63 = vpop.f32.mrf.mxu0 }
 0xb1f   :  { %v781_v0 = vadd.f32 %v968_v7, %v780_v63 }
 0xb21   :  { %785 = vst [vmem:[%s1275_s10] sm:$0xff] %v781_v0 }
 0xb26   :  { %v782_v1 = vpop.f32.mrf.mxu0 }
 0xb27   :  { %v783_v8 = vadd.f32 %v968_v7, %v782_v1 }
 0xb29   :  { %786 = vst [vmem:[%s1275_s10 + $0x8] sm:$0xff] %v783_v8 }

</bundles_post_ra>
